<compile_context>
chip_gen: v5e
topology: v5e:2x2
jax: 0.10.0
libtpu: 0.0.40
codegen_flags: <defaults>
</compile_context>

<pallas_src>
import functools

import jax
import jax.numpy as jnp
from jax.experimental import pallas as pl
from jax.experimental.pallas import tpu as pltpu


def _encoder_norm_kernel(params_ref, x_ref, o_ref, *, eps, batch):
    # params_ref: (2,) f32 in SMEM -> [alpha, bias]
    # x_ref / o_ref: (B, TS, D) block in VMEM
    x = x_ref[...].astype(jnp.float32)                 # single upcast copy
    alpha = params_ref[0]
    bias = params_ref[1]

    # mean over the feature (last) dim, keepdim
    mean = jnp.mean(x, axis=-1, keepdims=True)         # (B, TS, 1)

    # torch.std(dim=0, keepdim=True): unbiased (ddof=1) std over the batch dim.
    # Single-pass variance: E[x^2]*B - B*mu0^2, no full-size centered temp.
    mu0 = jnp.mean(x, axis=0, keepdims=True)           # (1, TS, D)
    sumsq = jnp.sum(x * x, axis=0, keepdims=True)      # (1, TS, D)
    # NOTE: for batch == 1 this divides by zero -> inf/nan, matching torch's
    # unbiased std semantics for N=1.
    var0 = (sumsq - batch * (mu0 * mu0)) / (batch - 1)
    var0 = jnp.maximum(var0, 0.0)                      # guard tiny negative cancellation
    std0 = jnp.sqrt(var0)                              # (1, TS, D)

    # Reciprocal on the small (1, TS, D) denominator only; EUP approx + one
    # Newton-Raphson step recovers ~f32 accuracy at negligible VPU cost.
    denom = std0 + eps
    inv = pl.reciprocal(denom, approx=True)
    inv = inv * (2.0 - denom * inv)
    scale = alpha * inv                                # fold alpha once, (1, TS, D)

    o_ref[...] = ((x - mean) * scale + bias).astype(o_ref.dtype)


def _pick_tile_s(B, S, D, itemsize, target_bytes=2 << 20):
    """Pick an S-tile: ~2 MiB stored block, multiple of 8 (f32 sublane tiling)."""
    if S <= 8 or S % 8 != 0:
        return S  # full-extent block is always a legal block shape
    ts = target_bytes // max(1, B * D * itemsize)
    ts = max(8, min(S, (ts // 8) * 8))
    return int(ts)


def encoder_forward(x, mask, alpha, bias, *, eps=1e-6, layers=(), block_s=None):
    """Pallas implementation of Encoder.forward.

    x:    (B, S, D)
    mask: passed to each encoder layer (unused here since `layers` is empty).
    alpha, bias: scalar LayerNormalization parameters (shape (1,) or scalar).
    """
    # --- encoder layers (external ModuleList; identity for empty list) ---
    for layer in layers:
        x = layer(x, mask)

    B, S, D = x.shape
    if block_s is None:
        block_s = _pick_tile_s(B, S, D, jnp.dtype(x.dtype).itemsize)
    block_s = int(block_s)

    # alpha/bias packed as a single (2,) SMEM scalar array.
    params = jnp.concatenate(
        [jnp.asarray(alpha, jnp.float32).reshape(1),
         jnp.asarray(bias, jnp.float32).reshape(1)])

    kernel = functools.partial(_encoder_norm_kernel, eps=float(eps), batch=B)

    grid = (pl.cdiv(S, block_s),)
    return pl.pallas_call(
        kernel,
        out_shape=jax.ShapeDtypeStruct((B, S, D), x.dtype),
        grid=grid,
        in_specs=[
            pl.BlockSpec(memory_space=pltpu.MemorySpace.SMEM),     # (alpha, bias)
            pl.BlockSpec((B, block_s, D), lambda s: (0, s, 0)),    # x slab over S
        ],
        out_specs=pl.BlockSpec((B, block_s, D), lambda s: (0, s, 0)),
        compiler_params=pltpu.CompilerParams(
            dimension_semantics=("parallel",),        # shard S-grid across TCs (v7x)
            vmem_limit_bytes=32 * 1024 * 1024,        # safe on v5e/v6e/v7x
        ),
    )(params, x)


def _reference(x, alpha, bias, eps=1e-6):
    # Pure-JAX reference mirroring the PyTorch code (including the dim=0 std).
    mean = jnp.mean(x, axis=-1, keepdims=True)
    std = jnp.std(x, axis=0, keepdims=True, ddof=1)
    return alpha * (x - mean) / (std + eps) + bias


if __name__ == "__main__":
    key = jax.random.PRNGKey(0)
    B, S, D = 4, 128, 128
    kx, km = jax.random.split(key)
    x = jax.random.normal(kx, (B, S, D), dtype=jnp.float32)
    # attention mask for the (empty) layer stack — shape (B, S, S)
    mask = (jax.random.uniform(km, (B, S, S)) > 0.1).astype(jnp.float32)

    # deterministic parameter init, matching nn.Parameter(torch.ones(1)/zeros(1))
    alpha = jnp.ones((1,), jnp.float32)
    bias = jnp.zeros((1,), jnp.float32)

    # block_s=32 -> grid=(4,) so the demo actually exercises the S-tiled pipeline.
    out = encoder_forward(x, mask, alpha, bias, block_s=32)
    out = jax.block_until_ready(out)

    ref = _reference(x, alpha[0], bias[0])
    assert out.shape == (B, S, D)
    err = jnp.max(jnp.abs(out - ref))
    # Tolerance accounts for the EUP approx-reciprocal + Newton step and the
    # single-pass variance (both ~1e-6 relative on this data).
    assert jnp.allclose(out, ref, atol=1e-4, rtol=1e-4), f"max abs err = {err}"
    print("KERNEL_OK")
</pallas_src>

<mosaic_0001>
module attributes {stable_mosaic.version = 11 : i64} {
  func.func @_encoder_norm_kernel(%arg0: i32, %arg1: memref<2xf32, #tpu.memory_space<smem>>, %arg2: memref<4x32x128xf32, #tpu.memory_space<vmem>>, %arg3: memref<4x32x128xf32, #tpu.memory_space<vmem>>) attributes {dimension_semantics = [#tpu.dimension_semantics<parallel>], iteration_bounds = array<i64: 4>, scalar_prefetch = 0 : i64, scratch_operands = 0 : i64, tpu.core_type = #tpu.core_type<tc>, window_params = [{transform_indices = @transform_0, window_bounds = array<i64: 2>}, {transform_indices = @transform_1, window_bounds = array<i64: 4, 32, 128>}, {transform_indices = @transform_2, window_bounds = array<i64: 4, 32, 128>}]} {
    %c0 = arith.constant 0 : index
    %c0_0 = arith.constant 0 : index
    %c0_1 = arith.constant 0 : index
    %0 = vector.load %arg2[%c0, %c0_0, %c0_1] : memref<4x32x128xf32, #tpu.memory_space<vmem>>, vector<4x32x128xf32>
    %c0_2 = arith.constant 0 : index
    %1 = memref.load %arg1[%c0_2] : memref<2xf32, #tpu.memory_space<smem>>
    %c1 = arith.constant 1 : index
    %2 = memref.load %arg1[%c1] : memref<2xf32, #tpu.memory_space<smem>>
    %cst = arith.constant dense<0.000000e+00> : vector<4x32xf32>
    %3 = vector.multi_reduction <add>, %0, %cst [2] : vector<4x32x128xf32> to vector<4x32xf32>
    %4 = vector.shape_cast %3 : vector<4x32xf32> to vector<4x32x1xf32>
    %cst_3 = arith.constant 1.280000e+02 : f32
    %5 = vector.broadcast %cst_3 : f32 to vector<4x32x1xf32>
    %6 = arith.divf %4, %5 : vector<4x32x1xf32>
    %cst_4 = arith.constant dense<0.000000e+00> : vector<32x128xf32>
    %7 = vector.multi_reduction <add>, %0, %cst_4 [0] : vector<4x32x128xf32> to vector<32x128xf32>
    %8 = vector.shape_cast %7 : vector<32x128xf32> to vector<1x32x128xf32>
    %cst_5 = arith.constant 4.000000e+00 : f32
    %9 = vector.broadcast %cst_5 : f32 to vector<1x32x128xf32>
    %10 = arith.divf %8, %9 : vector<1x32x128xf32>
    %11 = arith.mulf %0, %0 : vector<4x32x128xf32>
    %cst_6 = arith.constant dense<0.000000e+00> : vector<32x128xf32>
    %12 = vector.multi_reduction <add>, %11, %cst_6 [0] : vector<4x32x128xf32> to vector<32x128xf32>
    %13 = vector.shape_cast %12 : vector<32x128xf32> to vector<1x32x128xf32>
    %14 = arith.mulf %10, %10 : vector<1x32x128xf32>
    %cst_7 = arith.constant 4.000000e+00 : f32
    %15 = vector.broadcast %cst_7 : f32 to vector<1x32x128xf32>
    %16 = arith.mulf %15, %14 : vector<1x32x128xf32>
    %17 = arith.subf %13, %16 : vector<1x32x128xf32>
    %cst_8 = arith.constant 3.000000e+00 : f32
    %18 = vector.broadcast %cst_8 : f32 to vector<1x32x128xf32>
    %19 = arith.divf %17, %18 : vector<1x32x128xf32>
    %cst_9 = arith.constant 0.000000e+00 : f32
    %20 = vector.broadcast %cst_9 : f32 to vector<1x32x128xf32>
    %21 = arith.maximumf %19, %20 : vector<1x32x128xf32>
    %22 = math.sqrt %21 : vector<1x32x128xf32>
    %cst_10 = arith.constant 9.99999997E-7 : f32
    %23 = vector.broadcast %cst_10 : f32 to vector<1x32x128xf32>
    %24 = arith.addf %22, %23 : vector<1x32x128xf32>
    %25 = tpu.reciprocal %24 {approx = true} : vector<1x32x128xf32> -> vector<1x32x128xf32>
    %26 = arith.mulf %24, %25 : vector<1x32x128xf32>
    %cst_11 = arith.constant 2.000000e+00 : f32
    %27 = vector.broadcast %cst_11 : f32 to vector<1x32x128xf32>
    %28 = arith.subf %27, %26 : vector<1x32x128xf32>
    %29 = arith.mulf %25, %28 : vector<1x32x128xf32>
    %30 = vector.broadcast %1 : f32 to vector<1x32x128xf32>
    %31 = arith.mulf %30, %29 : vector<1x32x128xf32>
    %32 = vector.broadcast %6 : vector<4x32x1xf32> to vector<4x32x128xf32>
    %33 = arith.subf %0, %32 : vector<4x32x128xf32>
    %34 = vector.broadcast %31 : vector<1x32x128xf32> to vector<4x32x128xf32>
    %35 = arith.mulf %33, %34 : vector<4x32x128xf32>
    %36 = vector.broadcast %2 : f32 to vector<4x32x128xf32>
    %37 = arith.addf %35, %36 : vector<4x32x128xf32>
    %c0_12 = arith.constant 0 : index
    %c0_13 = arith.constant 0 : index
    %c0_14 = arith.constant 0 : index
    %38 = vector.load %arg3[%c0_12, %c0_13, %c0_14] : memref<4x32x128xf32, #tpu.memory_space<vmem>>, vector<4x32x128xf32>
    tpu.vector_store %arg3[%c0_12, %c0_13, %c0_14], %37 {strides = array<i32>} : memref<4x32x128xf32, #tpu.memory_space<vmem>>, vector<4x32x128xf32>,
    return
  }
  func.func @transform_0(%arg0: i32) -> i32 {
    %c0_i32 = arith.constant 0 : i32
    %c0_i32_0 = arith.constant 0 : i32
    return %c0_i32 : i32
  }
  func.func @transform_1(%arg0: i32) -> (i32, i32, i32) {
    %c0_i32 = arith.constant 0 : i32
    %c0_i32_0 = arith.constant 0 : i32
    %c0_i32_1 = arith.constant 0 : i32
    return %c0_i32, %arg0, %c0_i32_0 : i32, i32, i32
  }
  func.func @transform_2(%arg0: i32) -> (i32, i32, i32) {
    %c0_i32 = arith.constant 0 : i32
    %c0_i32_0 = arith.constant 0 : i32
    %c0_i32_1 = arith.constant 0 : i32
    return %c0_i32, %arg0, %c0_i32_0 : i32, i32, i32
  }
}

</mosaic_0001>

<bundles_post_ra>
// kernel: tpu_custom_call.1
= control target key start
LH: loop header
LB: loop body
LE: loop exit
PB: predicated region body
PF: predicated region fallthrough
CT: control target
= control target key end

     0   :  { %7 = vsyncpa [#allocation5], 0  ;;  %s1197_s0 = inlined_call_operand.hbm [shape: f32[2], index: 0, kind: input, shape index: {}]   ;;  %s1198_s1 = inlined_call_operand.hbm [shape: f32[4,128,128], index: 1, kind: input, shape index: {}]   ;;  %s1199_s2 = inlined_call_operand.hbm [shape: f32[4,128,128], index: 2, kind: output, shape index: {}]  }
   0x1   :  { %8 = vsyncpa [#allocation3], 0 }
   0x2   :  { %10 = vsyncpa [#allocation3 + $0x1], 0 }
   0x3   :  { %11 = vsyncpa [#allocation4], 0 }
   0x4   :  { %13 = vsyncpa [#allocation4 + $0x1], 0  ;;  %s833_s9 = smov 0   ;;  %s835_s10 = smov 0  }
   0x5   :  { %s837_s11 = smov 0   ;;  %s839_s12 = smov 0  }
   0x6 LB: > { %s854_s13 = sadd.s32 4294967295, %s799_s12   ;;  %s618_s14 = sadd.s32 4294967294, %s799_s12   ;;  %s799_s12 = sphi %s839_s12, %s1208_s12   ;;  %s795_s11 = sphi %s837_s11, %s1207_s11   ;;  %s791_s10 = sphi %s835_s10, %s1206_s10   ;;  %s787_s9 = sphi %s833_s9, %s1205_s9  }
   0x7   : > { %s858_s15 = sadd.s32 1, %s799_s12   ;;  %s47_s16 = sadd.s32 1, %s795_s11 }
   0x8   : > { %s44_s17 = ssub.s32 %s799_s12, %s858_s15  ;;  %p54_p0 = scmp.ne.s32.totalorder %s795_s11, %s791_s10 }
   0x9   : > { %p45_p1 = scmp.eq.s32.totalorder %s44_s17, 0  ;;  %p55_p2 = scmp.eq.s32.totalorder %s799_s12, 0 }
   0xa   : > { %p60_p3 = scmp.ne.s32.totalorder %s791_s10, %s787_s9  ;;  %p61_p4 = scmp.eq.s32.totalorder %s854_s13, 0 }
   0xb   : > { %s870_s18 = scalar_select %p45_p1, %s795_s11, %s47_s16  }
   0xc   : > { %p872_p5 = por %p55_p2, %p54_p0  ;;  %p878_p6 = por %p61_p4, %p60_p3 }
   0xd   : > { %p84_p7 = scmp.eq.s32.totalorder %s854_s13, 3  ;;  %p90_p8 = scmp.eq.s32.totalorder %s618_s14, 3 }
   0xe   : > { %p619_p9 = scmp.ge.s32.totalorder %s799_s12, 1  ;;  %p97_p10 = scmp.lt.s32.totalorder %s799_s12, 5 }
   0xf   : > { %p885_p11 = por %p84_p7, %p54_p0  ;;  %p889_p12 = por %p90_p8, %p60_p3 }
  0x10   : > { %p893_p13 = pnand %p619_p9, %p97_p10  ;;  %s109_s26 = sshll.u32 %s1197_s0, 4  ;;  %s110_s26 = int_to_ptr.hbm [resolvable:$true] %s109_s26 }
  0x11   : > { %s801_s27 = smov [#allocation2]   ;;  %p621_p2 = scmp.ge.s32.totalorder %s799_s12, 4 }
  0x12   : > { %p660_p1 = pneg %p893_p13 }
  0x13   : > { %116 = sbr.rel (%p621_p2) target bundleno = 38 (0x26), region = 20 }
  0x14   : > { %p661_p0 = pnand %p660_p1, %p61_p4 }
  0x16   : > { %663 = dma.hbm_to_smem (!%p661_p0), %s110_s26, 16, %s801_s27, [#allocation5]  }
  0x18   : > { %s120_s28 = sand.u32 1, %s795_s11   ;;  %s637_s29 = sshll.u32 %s799_s12, 5 }
  0x19   : > { %s622_s30 = sshll.u32 %s120_s28, 7  ;;  %s129_s5 = scalar_lea.hbm %s1198_s1, %s637_s29 }
  0x1a   : > { %s641_s6 = scalar_select %p872_p5, [#allocation0], [#allocation12] }
  0x1b   : > { %s142_s7 = sshll.u32 %s129_s5, 4  ;;  %s124_s8 = scalar_lea.vmem [#allocation6], %s622_s30  ;;  %s143_s7 = int_to_ptr.hbm [resolvable:$true] %s142_s7 }
  0x1c   : > { %s144_s14 = sshll.u32 %s124_s8, 4  ;;  %s134_s16 = sld [smem:[%s641_s6]]   ;;  %s145_s14 = int_to_ptr.vmem [resolvable:$true] %s144_s14 }
  0x1d   : > { %s802_s17 = smov 2048   ;;  %s803_s24 = smov 512  }
  0x1e   : > { %642 = sst [smem:[#allocation9]] (%p872_p5), %s802_s17  ;;  %s804_s25 = smov 4  }
  0x1f   : > { %643 = sst [smem:[#allocation9 + $0x1]] (%p872_p5), %s803_s24  ;;  %s805_s26 = smov 128  }
  0x20   : > { %644 = sst [smem:[#allocation9 + $0x2]] (%p872_p5), %s804_s25  ;;  %s806_s30 = smov 8  }
  0x21   : > { %645 = sst [smem:[#allocation9 + $0x3]] (%p872_p5), %s805_s26  ;;  %s121_s3 = scalar_lea.sflag [#allocation3], %s120_s28 }
  0x22   : > { %s625_s27 = sshll.u32 %s134_s16, 26  ;;  %646 = sst [smem:[#allocation9 + $0x4]] (%p872_p5), %s805_s26 }
  0x23   : > { %s626_s29 = sadd.s32 134217728, %s625_s27  ;;  %647 = sst [smem:[#allocation9 + $0x5]] (%p872_p5), %s806_s30 }
  0x24   : > { %s807_s4 = smov [#allocation8]  }
  0x25   : > { %648 = dma.general (%p872_p5), %s143_s7, 2048, %s145_s14, %s121_s3, %s807_s4, [#allocation9], %s626_s29, 0  }
  0x26 PF: > { %169 = sbr.rel (%p893_p13) target bundleno = 226 (0xe2), region = 28 }
  0x2b   : > { %774 = dma.done.wait (%p61_p4), [#allocation5], 16  }
  0x2c   : > { %776 = vsyncadd (%p61_p4), [#allocation5], 4294967280  ;;  %s933_s5 = sand.u32 1, %s791_s10  }
  0x2d   : > { %s629_s28 = sshll.u32 %s933_s5, 7  ;;  %s177_s19 = scalar_lea.sflag [#allocation3], %s933_s5 }
  0x2e   : > { %s939_s6 = scalar_lea.vmem [#allocation6], %s629_s28 }
  0x2f   : > { %778 = dma.done.wait (%p878_p6), %s177_s19, 2048  }
  0x30   : > { %780 = vsyncadd (%p878_p6), %s177_s19, 4294965248 }
  0x31   : > { %186 = sfence }
  0x32   : > { %v946_v0 = vld [vmem:[%s939_s6] sm:$0xff]  ;;  %v952_v2 = vld [vmem:[%s939_s6 + $0x10] sm:$0xff]  ;;  %v808_v3 = vmov 4.0   ;;  %v958_v4 = vld [vmem:[%s939_s6 + $0x8] sm:$0xff]  ;;  %v809_v14 = vmov 3.0   ;;  %s221_s20 = sld [smem:[#allocation2]] }
  0x33   : > { %v949_v1 = vld [vmem:[%s939_s6 + $0x20] sm:$0xff]  ;;  %223 = vadd.xlane.f32.xlu0 %v946_v0  ;;  %720 = vrcp.f32 %v808_v3  ;;  %227 = vadd.xlane.f32.xlu1 %v952_v2  ;;  %v961_v5 = vld [vmem:[%s939_s6 + $0x28] sm:$0xff]  ;;  %v964_v7 = vld [vmem:[%s939_s6 + $0x18] sm:$0xff]  ;;  %v301_v23 = vmul.f32 %v946_v0, %v946_v0  ;;  %v303_v31 = vmul.f32 %v952_v2, %v952_v2  ;;  %v302_v41 = vmul.f32 %v958_v4, %v958_v4  ;;  %s631_s23 = sld [smem:[#allocation2 + $0x1]]  ;;  %s1086_s7 = scalar_lea.vmem [#allocation7], %s629_s28 }
  0x34   : > { %231 = vadd.xlane.f32.xlu2 %v949_v1  ;;  %v970_v9 = vld [vmem:[%s939_s6 + $0x30] sm:$0xff]  ;;  %v973_v10 = vld [vmem:[%s939_s6 + $0x40] sm:$0xff]  ;;  %v976_v12 = vld [vmem:[%s939_s6 + $0x38] sm:$0xff]  ;;  %v278_v13 = vadd.f32 %v949_v1, %v946_v0  ;;  %722 = vrcp.f32 %v809_v14  ;;  %v305_v24 = vmul.f32 %v949_v1, %v949_v1  ;;  %v281_v26 = vadd.f32 %v961_v5, %v958_v4  ;;  %s495_s8 = scalar_lea.sflag [#allocation4], %s933_s5 }
  0x35   : > { %v284_v16 = vadd.f32 %v970_v9, %v952_v2  ;;  %v987_v18 = vld [vmem:[%s939_s6 + $0x48] sm:$0xff]  ;;  %v990_v19 = vld [vmem:[%s939_s6 + $0x58] sm:$0xff]  ;;  %v995_v22 = vld [vmem:[%s939_s6 + $0x50] sm:$0xff]  ;;  %v307_v32 = vmul.f32 %v970_v9, %v970_v9  ;;  %v309_v34 = vmul.f32 %v973_v10, %v973_v10  ;;  %v287_v35 = vadd.f32 %v976_v12, %v964_v7 }
  0x36   : > { %v279_v17 = vadd.f32 %v278_v13, %v973_v10  ;;  %v1002_v25 = vld [vmem:[%s939_s6 + $0x60] sm:$0xff]  ;;  %v317_v33 = vadd.f32 %v305_v24, %v301_v23  ;;  %v1021_v36 = vld [vmem:[%s939_s6 + $0x70] sm:$0xff]  ;;  %v282_v37 = vadd.f32 %v281_v26, %v987_v18  ;;  %v306_v42 = vmul.f32 %v961_v5, %v961_v5  ;;  %v1030_v44 = vld [vmem:[%s939_s6 + $0x68] sm:$0xff] }
  0x37   : > { %v285_v27 = vadd.f32 %v284_v16, %v995_v22  ;;  %v323_v43 = vadd.f32 %v307_v32, %v303_v31  ;;  %v288_v46 = vadd.f32 %v287_v35, %v990_v19  ;;  %v311_v47 = vmul.f32 %v995_v22, %v995_v22  ;;  %v1051_v60 = vld [vmem:[%s939_s6 + $0x78] sm:$0xff] }
  0x38   : > { %v280_v28 = vadd.f32 %v279_v17, %v1002_v25  ;;  %v318_v45 = vadd.f32 %v317_v33, %v309_v34  ;;  %v313_v48 = vmul.f32 %v1002_v25, %v1002_v25  ;;  %v283_v51 = vadd.f32 %v282_v37, %v1030_v44 }
  0x39   : > { %v721_v6 = vpop.eup %720  ;;  %v286_v39 = vadd.f32 %v285_v27, %v1021_v36  ;;  %v320_v53 = vadd.f32 %v306_v42, %v302_v41  ;;  %v304_v54 = vmul.f32 %v964_v7, %v964_v7  ;;  %v308_v55 = vmul.f32 %v976_v12, %v976_v12 }
  0x3a   : > { %v291_v8 = vmul.f32 4.0, %v721_v6  ;;  %v992_v21 = vpop.eup %722  ;;  %vm295_vm0 = vweird.f32 %v721_v6  ;;  %v310_v56 = vmul.f32 %v987_v18, %v987_v18  ;;  %v324_v57 = vadd.f32 %v323_v43, %v311_v47 }
  0x3b   : > { %225 = vadd.xlane.f32.xlu0 %v958_v4  ;;  %229 = vadd.xlane.f32.xlu1 %v964_v7  ;;  %v342_v30 = vmul.f32 3.0, %v992_v21  ;;  %v319_v58 = vadd.f32 %v318_v45, %v313_v48  ;;  %v315_v59 = vmul.f32 %v1021_v36, %v1021_v36  ;;  %v289_v3 = vadd.f32 %v288_v46, %v1051_v60 }
  0x3c   : > { %233 = vadd.xlane.f32.xlu2 %v961_v5  ;;  %v292_v11 = vsub.f32 1.0, %v291_v8  ;;  %v312_v8 = vmul.f32 %v990_v19, %v990_v19  ;;  %vm346_vm1 = vweird.f32 %v992_v21  ;;  %v321_v13 = vadd.f32 %v320_v53, %v310_v56 }
  0x3d   : > { %v343_v40 = vsub.f32 1.0, %v342_v30  ;;  %v325_v14 = vadd.f32 %v324_v57, %v315_v59 }
  0x3e   : > { %v293_v15 = vmul.f32 %v721_v6, %v292_v11  ;;  %v326_v11 = vadd.f32 %v308_v55, %v304_v54 }
  0x3f   : > { %v344_v52 = vmul.f32 %v992_v21, %v343_v40 }
  0x40   : > { %v294_v20 = vadd.f32 %v721_v6, %v293_v15  ;;  %v314_v15 = vmul.f32 %v1030_v44, %v1030_v44  ;;  %v327_v26 = vadd.f32 %v326_v11, %v312_v8 }
  0x42   : > { %v296_v29 = vsel %vm295_vm0, %v721_v6, %v294_v20  ;;  %v345_v6 = vadd.f32 %v992_v21, %v344_v52  ;;  %v322_v27 = vadd.f32 %v321_v13, %v314_v15 }
  0x43   : > { %235 = vadd.xlane.f32.xlu0 %v970_v9  ;;  %237 = vadd.xlane.f32.xlu1 %v976_v12  ;;  %v297_v38 = vmul.f32 %v296_v29, %v280_v28  ;;  %v299_v50 = vmul.f32 %v296_v29, %v286_v39  ;;  %v298_v63 = vmul.f32 %v296_v29, %v283_v51 }
  0x44   : > { %239 = vadd.xlane.f32.xlu2 %v973_v10  ;;  %v300_v23 = vmul.f32 %v296_v29, %v289_v3  ;;  %v347_v24 = vsel %vm346_vm1, %v992_v21, %v345_v6  ;;  %v316_v28 = vmul.f32 %v1051_v60, %v1051_v60 }
  0x45   : > { %v329_v49 = vmul.f32 %v297_v38, %v297_v38  ;;  %v331_v62 = vmul.f32 %v299_v50, %v299_v50  ;;  %v330_v20 = vmul.f32 %v298_v63, %v298_v63 }
  0x46   : > { %v332_v33 = vmul.f32 %v300_v23, %v300_v23  ;;  %v328_v34 = vadd.f32 %v327_v26, %v316_v28  ;;  %v810_v26 = vmov 128.0  }
  0x47   : > { %v333_v61 = vmul.f32 4.0, %v329_v49  ;;  %v335_v17 = vmul.f32 4.0, %v331_v62  ;;  %v334_v32 = vmul.f32 4.0, %v330_v20 }
  0x48   : > { %v336_v39 = vmul.f32 4.0, %v332_v33 }
  0x49   : > { %v337_v16 = vsub.f32 %v319_v58, %v333_v61  ;;  %v339_v31 = vsub.f32 %v325_v14, %v335_v17  ;;  %v338_v38 = vsub.f32 %v322_v27, %v334_v32 }
  0x4a   : > { %v340_v41 = vsub.f32 %v328_v34, %v336_v39 }
  0x4b   : > { %241 = vadd.xlane.f32.xlu0 %v987_v18  ;;  %243 = vadd.xlane.f32.xlu1 %v995_v22  ;;  %v348_v30 = vmul.f32 %v347_v24, %v337_v16  ;;  %v350_v37 = vmul.f32 %v347_v24, %v339_v31  ;;  %v349_v40 = vmul.f32 %v347_v24, %v338_v38 }
  0x4c   : > { %245 = vadd.xlane.f32.xlu2 %v990_v19  ;;  %v351_v42 = vmul.f32 %v347_v24, %v340_v41 }
  0x4d   : > { %v352_v35 = vmax.f32 %v348_v30, 0.0  ;;  %v354_v29 = vmax.f32 %v350_v37, 0.0  ;;  %v353_v21 = vmax.f32 %v349_v40, 0.0 }
  0x4e   : > { %v355_v45 = vmax.f32 %v351_v42, 0.0 }
  0x4f   : > { %724 = vrsqrt.f32 %v352_v35  ;;  %vm363_vm2 = vcmp.eq.f32.partialorder %v352_v35, inf  ;;  %vm387_vm3 = vcmp.eq.f32.partialorder %v354_v29, inf  ;;  %v366_v15 = vand.u32 2147483648, %v352_v35 }
  0x50   : > { %726 = vrsqrt.f32 %v354_v29  ;;  %vm365_vm4 = vcmp.eq.f32.partialorder %v352_v35, 0.0  ;;  %v390_v17 = vand.u32 2147483648, %v354_v29  ;;  %vm389_vm5 = vcmp.eq.f32.partialorder %v354_v29, 0.0 }
  0x51   : > { %728 = vrsqrt.f32 %v353_v21  ;;  %vm375_vm6 = vcmp.eq.f32.partialorder %v353_v21, inf  ;;  %vm399_vm7 = vcmp.eq.f32.partialorder %v355_v45, inf  ;;  %v378_v34 = vand.u32 2147483648, %v353_v21 }
  0x52   : > { %730 = vrsqrt.f32 %v355_v45  ;;  %vm377_vm8 = vcmp.eq.f32.partialorder %v353_v21, 0.0  ;;  %v402_v38 = vand.u32 2147483648, %v355_v45  ;;  %vm401_vm9 = vcmp.eq.f32.partialorder %v355_v45, 0.0 }
  0x53   : > { %247 = vadd.xlane.f32.xlu0 %v1002_v25  ;;  %249 = vadd.xlane.f32.xlu1 %v1030_v44  ;;  %732 = vrcp.f32 %v810_v26 }
  0x54   : > { %251 = vadd.xlane.f32.xlu2 %v1021_v36 }
  0x55   : > { %v725_v43 = vpop.eup %724 }
  0x56   : > { %v357_v46 = vmul.f32 %v725_v43, %v352_v35  ;;  %v727_v47 = vpop.eup %726 }
  0x57   : > { %v381_v49 = vmul.f32 %v727_v47, %v354_v29  ;;  %v729_v50 = vpop.eup %728 }
  0x58   : > { %v358_v48 = vmul.f32 %v725_v43, %v357_v46  ;;  %v369_v53 = vmul.f32 %v729_v50, %v353_v21  ;;  %v731_v54 = vpop.eup %730 }
  0x59   : > { %v382_v51 = vmul.f32 %v727_v47, %v381_v49  ;;  %v393_v58 = vmul.f32 %v731_v54, %v355_v45 }
  0x5a   : > { %v359_v52 = vmul.f32 0.5, %v358_v48  ;;  %v370_v57 = vmul.f32 %v729_v50, %v369_v53 }
  0x5b   : > { %253 = vadd.xlane.f32.xlu0 %v1051_v60  ;;  %v383_v55 = vmul.f32 0.5, %v382_v51  ;;  %v394_v61 = vmul.f32 %v731_v54, %v393_v58  ;;  %v424_v58 = vstv %s221_s20 }
  0x5c   : > { %v360_v56 = vsub.f32 1.5, %v359_v52  ;;  %v371_v63 = vmul.f32 0.5, %v370_v57 }
  0x5d   : > { %v384_v59 = vsub.f32 1.5, %v383_v55  ;;  %v395_v6 = vmul.f32 0.5, %v394_v61 }
  0x5e   : > { %v361_v62 = vmul.f32 %v725_v43, %v360_v56  ;;  %v372_v11 = vsub.f32 1.5, %v371_v63 }
  0x5f   : > { %v385_v3 = vmul.f32 %v727_v47, %v384_v59  ;;  %v396_v14 = vsub.f32 1.5, %v395_v6 }
  0x60   : > { %v362_v8 = vmul.f32 %v361_v62, %v352_v35  ;;  %v373_v20 = vmul.f32 %v729_v50, %v372_v11 }
  0x61   : > { %v386_v13 = vmul.f32 %v385_v3, %v354_v29  ;;  %v397_v24 = vmul.f32 %v731_v54, %v396_v14 }
  0x62   : > { %v364_v16 = vsel %vm363_vm2, %v352_v35, %v362_v8  ;;  %v374_v30 = vmul.f32 %v373_v20, %v353_v21  ;;  %v733_v35 = vpop.eup %732 }
  0x63   : > { %v388_v23 = vsel %vm387_vm3, %v354_v29, %v386_v13  ;;  %v367_v27 = vsel %vm365_vm4, %v366_v15, %v364_v16  ;;  %v398_v31 = vmul.f32 %v397_v24, %v355_v45  ;;  %v256_v40 = vmul.f32 128.0, %v733_v35 }
  0x64   : > { %v391_v28 = vsel %vm389_vm5, %v390_v17, %v388_v23  ;;  %v404_v32 = vadd.f32 1e-06, %v367_v27  ;;  %v376_v37 = vsel %vm375_vm6, %v353_v21, %v374_v30  ;;  %vm260_vm10 = vweird.f32 %v733_v35 }
  0x65   : > { %v406_v33 = vadd.f32 1e-06, %v391_v28  ;;  %v400_v39 = vsel %vm399_vm7, %v355_v45, %v398_v31  ;;  %v379_v29 = vsel %vm377_vm8, %v378_v34, %v376_v37  ;;  %v257_v47 = vsub.f32 1.0, %v256_v40 }
  0x66   : > { %734 = vrcp.f32 %v404_v32  ;;  %v403_v41 = vsel %vm401_vm9, %v402_v38, %v400_v39  ;;  %v405_v42 = vadd.f32 1e-06, %v379_v29  ;;  %v1075_v23 = vstv %s631_s23 }
  0x67   : > { %736 = vrcp.f32 %v406_v33  ;;  %v407_v43 = vadd.f32 1e-06, %v403_v41  ;;  %v258_v50 = vmul.f32 %v733_v35, %v257_v47 }
  0x68   : > { %738 = vrcp.f32 %v405_v42 }
  0x69   : > { %740 = vrcp.f32 %v407_v43  ;;  %v259_v53 = vadd.f32 %v733_v35, %v258_v50 }
  0x6b   : > { %v1064_v57 = vsel %vm260_vm10, %v733_v35, %v259_v53 }
  0x6c   : > { %v735_v46 = vpop.eup %734 }
  0x6d   : > { %v737_v48 = vpop.eup %736  ;;  %v412_v49 = vmul.f32 %v735_v46, %v404_v32 }
  0x6e   : > { %v414_v21 = vmul.f32 %v737_v48, %v406_v33  ;;  %v739_v52 = vpop.eup %738 }
  0x6f   : > { %v416_v51 = vsub.f32 2.0, %v412_v49  ;;  %v741_v54 = vpop.eup %740  ;;  %v413_v56 = vmul.f32 %v739_v52, %v405_v42 }
  0x70   : > { %v418_v45 = vsub.f32 2.0, %v414_v21  ;;  %v415_v61 = vmul.f32 %v741_v54, %v407_v43 }
  0x71   : > { %v420_v55 = vmul.f32 %v735_v46, %v416_v51  ;;  %v417_v13 = vsub.f32 2.0, %v413_v56 }
  0x72   : > { %v422_v59 = vmul.f32 %v737_v48, %v418_v45  ;;  %v419_v16 = vsub.f32 2.0, %v415_v61 }
  0x73   : > { %v1067_v6 = vmul.f32 %v424_v58, %v420_v55  ;;  %v421_v28 = vmul.f32 %v739_v52, %v417_v13 }
  0x74   : > { %v1071_v15 = vmul.f32 %v424_v58, %v422_v59  ;;  %v423_v31 = vmul.f32 %v741_v54, %v419_v16 }
  0x76   : > { %v1094_v39 = vmul.f32 %v424_v58, %v423_v31 }
  0xa6   : > { %v224_v62 = vpop.xlane.xlu0 %223  ;;  %v228_v11 = vpop.xlane.xlu1 %227 }
  0xa7   : > { %v232_v63 = vpop.xlane.xlu2 %231  ;;  %v262_v3 = vmul.f32 %v1064_v57, %v224_v62  ;;  %v264_v14 = vmul.f32 %v1064_v57, %v228_v11 }
  0xa8   : > { %v266_v8 = vmul.f32 %v1064_v57, %v232_v63 }
  0xa9   : > { %v429_v17 = vsub.f32 %v946_v0, %v262_v3  ;;  %v431_v24 = vsub.f32 %v952_v2, %v264_v14  ;;  %v1089_v2 = vmul.f32 %v424_v58, %v421_v28 }
  0xaa   : > { %v433_v20 = vsub.f32 %v949_v1, %v266_v8 }
  0xab   : > { %v445_v26 = vmul.f32 %v429_v17, %v1067_v6  ;;  %v447_v30 = vmul.f32 %v431_v24, %v1071_v15 }
  0xac   : > { %v449_v27 = vmul.f32 %v433_v20, %v1067_v6 }
  0xad   : > { %v462_v32 = vadd.f32 %v1075_v23, %v445_v26  ;;  %v464_v0 = vadd.f32 %v1075_v23, %v447_v30 }
  0xae   : > { %v466_v33 = vadd.f32 %v1075_v23, %v449_v27  ;;  %v226_v34 = vpop.xlane.xlu0 %225  ;;  %v230_v35 = vpop.xlane.xlu1 %229 }
  0xaf   : > { %v234_v1 = vpop.xlane.xlu2 %233  ;;  %478 = vst [vmem:[%s1086_s7] sm:$0xff] %v462_v32  ;;  %v263_v37 = vmul.f32 %v1064_v57, %v226_v34  ;;  %v265_v29 = vmul.f32 %v1064_v57, %v230_v35 }
  0xb0   : > { %v267_v38 = vmul.f32 %v1064_v57, %v234_v1  ;;  %482 = vst [vmem:[%s1086_s7 + $0x20] sm:$0xff] %v466_v33 }
  0xb1   : > { %480 = vst [vmem:[%s1086_s7 + $0x10] sm:$0xff] %v464_v0  ;;  %v430_v40 = vsub.f32 %v958_v4, %v263_v37  ;;  %v432_v42 = vsub.f32 %v964_v7, %v265_v29 }
  0xb2   : > { %v434_v41 = vsub.f32 %v961_v5, %v267_v38 }
  0xb3   : > { %v446_v43 = vmul.f32 %v430_v40, %v1089_v2  ;;  %v448_v47 = vmul.f32 %v432_v42, %v1094_v39 }
  0xb4   : > { %v450_v46 = vmul.f32 %v434_v41, %v1089_v2 }
  0xb5   : > { %v463_v48 = vadd.f32 %v1075_v23, %v446_v43  ;;  %v465_v50 = vadd.f32 %v1075_v23, %v448_v47 }
  0xb6   : > { %v467_v49 = vadd.f32 %v1075_v23, %v450_v46  ;;  %v236_v21 = vpop.xlane.xlu0 %235  ;;  %v238_v7 = vpop.xlane.xlu1 %237 }
  0xb7   : > { %v240_v51 = vpop.xlane.xlu2 %239  ;;  %479 = vst [vmem:[%s1086_s7 + $0x8] sm:$0xff] %v463_v48  ;;  %v268_v4 = vmul.f32 %v1064_v57, %v236_v21  ;;  %v269_v52 = vmul.f32 %v1064_v57, %v238_v7 }
  0xb8   : > { %v270_v5 = vmul.f32 %v1064_v57, %v240_v51  ;;  %483 = vst [vmem:[%s1086_s7 + $0x28] sm:$0xff] %v467_v49 }
  0xb9   : > { %481 = vst [vmem:[%s1086_s7 + $0x18] sm:$0xff] %v465_v50  ;;  %v435_v53 = vsub.f32 %v970_v9, %v268_v4  ;;  %v436_v54 = vsub.f32 %v976_v12, %v269_v52 }
  0xba   : > { %v437_v45 = vsub.f32 %v973_v10, %v270_v5 }
  0xbb   : > { %v451_v55 = vmul.f32 %v435_v53, %v1071_v15  ;;  %v452_v58 = vmul.f32 %v436_v54, %v1094_v39 }
  0xbc   : > { %v453_v56 = vmul.f32 %v437_v45, %v1067_v6 }
  0xbd   : > { %v468_v59 = vadd.f32 %v1075_v23, %v451_v55  ;;  %v469_v62 = vadd.f32 %v1075_v23, %v452_v58 }
  0xbe   : > { %v470_v61 = vadd.f32 %v1075_v23, %v453_v56  ;;  %v242_v63 = vpop.xlane.xlu0 %241  ;;  %v244_v12 = vpop.xlane.xlu1 %243 }
  0xbf   : > { %v246_v3 = vpop.xlane.xlu2 %245  ;;  %484 = vst [vmem:[%s1086_s7 + $0x30] sm:$0xff] %v468_v59  ;;  %v271_v9 = vmul.f32 %v1064_v57, %v242_v63  ;;  %v272_v8 = vmul.f32 %v1064_v57, %v244_v12 }
  0xc0   : > { %v273_v10 = vmul.f32 %v1064_v57, %v246_v3  ;;  %486 = vst [vmem:[%s1086_s7 + $0x40] sm:$0xff] %v470_v61 }
  0xc1   : > { %485 = vst [vmem:[%s1086_s7 + $0x38] sm:$0xff] %v469_v62  ;;  %v438_v11 = vsub.f32 %v987_v18, %v271_v9  ;;  %v439_v14 = vsub.f32 %v995_v22, %v272_v8 }
  0xc2   : > { %v440_v13 = vsub.f32 %v990_v19, %v273_v10 }
  0xc3   : > { %v454_v16 = vmul.f32 %v438_v11, %v1089_v2  ;;  %v455_v20 = vmul.f32 %v439_v14, %v1071_v15 }
  0xc4   : > { %v456_v17 = vmul.f32 %v440_v13, %v1094_v39 }
  0xc5   : > { %v471_v24 = vadd.f32 %v1075_v23, %v454_v16  ;;  %v472_v27 = vadd.f32 %v1075_v23, %v455_v20 }
  0xc6   : > { %v473_v26 = vadd.f32 %v1075_v23, %v456_v17  ;;  %v248_v28 = vpop.xlane.xlu0 %247  ;;  %v250_v22 = vpop.xlane.xlu1 %249 }
  0xc7   : > { %v252_v30 = vpop.xlane.xlu2 %251  ;;  %487 = vst [vmem:[%s1086_s7 + $0x48] sm:$0xff] %v471_v24  ;;  %v274_v18 = vmul.f32 %v1064_v57, %v248_v28  ;;  %v275_v31 = vmul.f32 %v1064_v57, %v250_v22 }
  0xc8   : > { %v276_v19 = vmul.f32 %v1064_v57, %v252_v30  ;;  %489 = vst [vmem:[%s1086_s7 + $0x58] sm:$0xff] %v473_v26 }
  0xc9   : > { %488 = vst [vmem:[%s1086_s7 + $0x50] sm:$0xff] %v472_v27  ;;  %v441_v32 = vsub.f32 %v1002_v25, %v274_v18  ;;  %v442_v0 = vsub.f32 %v1030_v44, %v275_v31 }
  0xca   : > { %v443_v33 = vsub.f32 %v1021_v36, %v276_v19 }
  0xcb   : > { %v457_v34 = vmul.f32 %v441_v32, %v1067_v6  ;;  %v458_v37 = vmul.f32 %v442_v0, %v1089_v2 }
  0xcc   : > { %v459_v1 = vmul.f32 %v443_v33, %v1071_v15 }
  0xcd   : > { %v474_v38 = vadd.f32 %v1075_v23, %v457_v34  ;;  %v475_v29 = vadd.f32 %v1075_v23, %v458_v37 }
  0xce   : > { %v476_v35 = vadd.f32 %v1075_v23, %v459_v1  ;;  %v254_v40 = vpop.xlane.xlu0 %253 }
  0xcf   : > { %490 = vst [vmem:[%s1086_s7 + $0x60] sm:$0xff] %v474_v38  ;;  %v277_v25 = vmul.f32 %v1064_v57, %v254_v40 }
  0xd0   : > { %492 = vst [vmem:[%s1086_s7 + $0x70] sm:$0xff] %v476_v35 }
  0xd1   : > { %491 = vst [vmem:[%s1086_s7 + $0x68] sm:$0xff] %v475_v29  ;;  %v444_v36 = vsub.f32 %v1051_v60, %v277_v25 }
  0xd3   : > { %v460_v44 = vmul.f32 %v444_v36, %v1094_v39 }
  0xd5   : > { %v477_v6 = vadd.f32 %v1075_v23, %v460_v44 }
  0xd7   : > { %493 = vst [vmem:[%s1086_s7 + $0x78] sm:$0xff] %v477_v6 }
  0xd8   : > { %s638_s14 = sshll.u32 %s854_s13, 5  ;;  %s517_s16 = sshll.u32 %s1086_s7, 4  ;;  %s518_s16 = int_to_ptr.vmem [resolvable:$true] %s517_s16 }
  0xd9   : > { %s506_s25 = scalar_lea.hbm %s1199_s2, %s638_s14  ;;  %s811_s27 = smov 512  }
  0xda   : > { %s519_s26 = sshll.u32 %s506_s25, 4  ;;  %652 = sst [smem:[#allocation11]] (%p885_p11), %s811_s27  ;;  %s520_s26 = int_to_ptr.hbm [resolvable:$true] %s519_s26 }
  0xdb   : > { %s812_s29 = smov 2048   ;;  %s813_s30 = smov 4  }
  0xdc   : > { %653 = sst [smem:[#allocation11 + $0x1]] (%p885_p11), %s812_s29  ;;  %s814_s13 = smov 128  }
  0xdd   : > { %654 = sst [smem:[#allocation11 + $0x2]] (%p885_p11), %s813_s30  ;;  %s815_s3 = smov 8  }
  0xde   : > { %655 = sst [smem:[#allocation11 + $0x3]] (%p885_p11), %s814_s13  ;;  %s816_s4 = smov [#allocation10]  }
  0xdf   : > { %656 = sst [smem:[#allocation11 + $0x4]] (%p885_p11), %s814_s13  ;;  %s817_s5 = smov 0  }
  0xe0   : > { %657 = sst [smem:[#allocation11 + $0x5]] (%p885_p11), %s815_s3 }
  0xe1   : > { %658 = dma.general (%p885_p11), %s518_s16, 2048, %s520_s26, %s495_s8, %s816_s4, [#allocation11], %s817_s5, 0  }
  0xe2 PF: > { %p670_p3 = scmp.ge.s32.totalorder %s799_s12, 2  ;;  %s547_s28 = sand.u32 1, %s787_s9  }
  0xe3   : > { %s548_s19 = scalar_lea.sflag [#allocation4], %s547_s28 }
  0xe4   : > { %p665_p4 = pnand %p670_p3, %p889_p12 }
  0xe6   : > { %p666_p5 = pneg %p665_p4 }
  0xe8   : > { %782 = dma.done.wait (%p666_p5), %s548_s19, 2048  }
  0xe9   : > { %784 = vsyncadd (%p666_p5), %s548_s19, 4294965248  ;;  %p16_p6 = scmp.ge.s32.totalorder %s858_s15, 6   ;;  %s1205_s9 = smov %s791_s10 }
  0xea   : > { %s1206_s10 = smov %s795_s11  ;;  %s1207_s11 = smov %s870_s18 }
  0xeb   : > { %s1208_s12 = smov %s858_s15  ;;  %18 = sbr.rel (!%p16_p6) target bundleno = 6 (0x6), region = 88 }
  0xf0   :  { %554 = vsyncpa [#allocation3], 1 }
  0xf1   :  { %556 = vsyncpa [#allocation3 + $0x1], 1 }
  0xf2   :  { %557 = vsyncpa [#allocation4], 1 }
  0xf3   :  { %559 = vsyncpa [#allocation4 + $0x1], 1 }
  0xf4   :  { %560 = vsyncpa [#allocation5], 1 }
  0xf5   :  { %562 = vsyncpa [#allocation5 + $0x1], 1 }

</bundles_post_ra>
